<compile_context>
chip_gen: v7x
topology: tpu7x:2x2x1
jax: 0.10.0
libtpu: 0.0.40
codegen_flags: <defaults>
</compile_context>

<pallas_src>
import jax
import jax.numpy as jnp
from jax.experimental import pallas as pl
from jax.experimental.pallas import tpu as pltpu


def _gaussian_pdf_kernel(params_ref, x_ref, o_ref):
    # params (SMEM scalar prefetch): [mu0, mu1, a, b, cc, logc]
    #   a    = -0.5 * cov[0, 0]
    #   b    = -0.5 * (cov[0, 1] + cov[1, 0])
    #   cc   = -0.5 * cov[1, 1]
    #   logc = log(c)            (c > 0; c == 1.0 in the reference module)
    mu0 = params_ref[0]
    mu1 = params_ref[1]
    a = params_ref[2]
    b = params_ref[3]
    cc = params_ref[4]
    logc = params_ref[5]

    # x_ref block: (2, ts, 128)  ->  two dense (ts, 128) planes.
    # astype is a no-op for f32 inputs; enables bf16 ingestion with f32 math
    # (v5e has no bf16 VPU/EUP path, so all arithmetic stays f32).
    d0 = x_ref[0].astype(jnp.float32) - mu0           # VPU
    d1 = x_ref[1].astype(jnp.float32) - mu1           # VPU
    # Row-wise -0.5 * (x - mu) @ cov @ (x - mu)^T, unrolled 2x2 quadratic form,
    # factored to save a multiply (v5e/v6e VPU has no f32 FMA).
    q = d0 * (a * d0 + b * d1) + cc * (d1 * d1)       # VPU
    o_ref[...] = jnp.exp(q + logc)                    # EUP exp, dense f32 store


def my_gaussian_pdf_planar(x_planar, mu, cov, c, *, block_rows=None):
    """Planar fast path.

    x_planar: (2, S, 128) float32/bfloat16; point p = s*128 + lane lives at
              x_planar[:, s, lane].  Padded tail lanes may hold any finite value.
    Returns:  (S, 128) float32 of pdf values in the same layout.
    """
    two, S, lanes = x_planar.shape
    assert two == 2 and lanes == 128

    if block_rows is not None:
        ts = min(int(block_rows), S)
        if ts != S:
            ts = max(8, (ts // 8) * 8)        # keep (8, 128) block constraint
    elif S <= 64:
        ts = S                                # tiny problem: single block (ts == S is legal)
    else:
        # ~2 MiB input blocks, aiming for >= 4 grid steps (v7x megacore sharding).
        ts = min(2048, max(8, ((pl.cdiv(S, 4) + 7) // 8) * 8))
    grid = (pl.cdiv(S, ts),)                  # partial last block is masked by Pallas

    mu = mu.astype(jnp.float32)
    cov = cov.astype(jnp.float32)
    c = jnp.asarray(c, jnp.float32)
    params = jnp.stack(
        [
            mu[0],
            mu[1],
            -0.5 * cov[0, 0],
            -0.5 * (cov[0, 1] + cov[1, 0]),
            -0.5 * cov[1, 1],
            jnp.log(c),                       # c > 0 (PDF normalizer)
        ]
    ).astype(jnp.float32)

    return pl.pallas_call(
        _gaussian_pdf_kernel,
        out_shape=jax.ShapeDtypeStruct((S, 128), jnp.float32),
        grid_spec=pltpu.PrefetchScalarGridSpec(
            num_scalar_prefetch=1,
            grid=grid,
            in_specs=[
                pl.BlockSpec((2, ts, 128), lambda i, params: (0, i, 0)),  # x planar
            ],
            out_specs=pl.BlockSpec((ts, 128), lambda i, params: (i, 0)),
        ),
        compiler_params=pltpu.CompilerParams(
            dimension_semantics=("parallel",),
        ),
    )(params, x_planar)


def my_gaussian_pdf(x, mu, cov, c, *, block_rows=None):
    """Compatibility wrapper.  x: (B, 2), mu: (2,), cov: (2, 2), c > 0 -> (B,) f32."""
    if isinstance(c, (int, float)):
        assert c > 0, "c must be positive (folded into the exponent as log(c))"
    B = x.shape[0]
    S = pl.cdiv(B, 128)
    Bp = S * 128

    # One-time relayout (B, 2) -> (2, S, 128): batch on lanes, padded only to
    # the 128-lane granularity (never to a full block).  Producers that already
    # hold the planar layout should call my_gaussian_pdf_planar directly and
    # skip this extra HBM pass.
    xt = x.astype(jnp.float32).T              # (2, B)
    if Bp != B:
        xt = jnp.pad(xt, ((0, 0), (0, Bp - B)))
    x_planar = xt.reshape(2, S, 128)

    out = my_gaussian_pdf_planar(x_planar, mu, cov, c, block_rows=block_rows)
    return out.reshape(Bp)[:B]


if __name__ == "__main__":
    key = jax.random.PRNGKey(0)
    kmu, k1, k2, k3 = jax.random.split(key, 4)

    cov = 0.54 * jnp.eye(2, dtype=jnp.float32)
    c = 1.0
    mu = jax.random.normal(kmu, (2,), dtype=jnp.float32)

    def ref_fn(x):
        d = x - mu[None, :]
        q = jnp.einsum("bi,ij,bj->b", d, cov, d, precision=jax.lax.Precision.HIGHEST)
        return c * jnp.exp(-0.5 * q)

    # 1) Small batch of 2-D points.
    B = 8
    x = jax.random.normal(k1, (B, 2), dtype=jnp.float32)
    out = jax.block_until_ready(my_gaussian_pdf(x, mu, cov, c))
    assert out.shape == (B,)
    assert jnp.allclose(out, ref_fn(x), atol=1e-5, rtol=1e-5), (out, ref_fn(x))

    # 2) Non-multiple-of-128 batch (exercises the lane-padding path).
    B2 = 300
    x2 = jax.random.normal(k2, (B2, 2), dtype=jnp.float32)
    out2 = jax.block_until_ready(my_gaussian_pdf(x2, mu, cov, c))
    assert out2.shape == (B2,)
    assert jnp.allclose(out2, ref_fn(x2), atol=1e-5, rtol=1e-5)

    # 3) Multi-step grid with a partial final block (forced small block_rows):
    #    B3 = 2560 -> S = 20 rows, ts = 8 -> grid of 3 steps, last block ragged.
    B3 = 2560
    x3 = jax.random.normal(k3, (B3, 2), dtype=jnp.float32)
    out3 = jax.block_until_ready(my_gaussian_pdf(x3, mu, cov, c, block_rows=8))
    assert out3.shape == (B3,)
    assert jnp.allclose(out3, ref_fn(x3), atol=1e-5, rtol=1e-5)

    print("KERNEL_OK")
</pallas_src>

<mosaic_0001>
module attributes {stable_mosaic.version = 11 : i64} {
  func.func @_gaussian_pdf_kernel(%arg0: i32, %arg1: memref<6xf32, #tpu.memory_space<smem>>, %arg2: memref<2x1x128xf32, #tpu.memory_space<vmem>>, %arg3: memref<1x128xf32, #tpu.memory_space<vmem>>) attributes {dimension_semantics = [#tpu.dimension_semantics<parallel>], iteration_bounds = array<i64: 1>, scalar_prefetch = 1 : i64, scratch_operands = 0 : i64, tpu.core_type = #tpu.core_type<tc>, window_params = [{transform_indices = @transform_0, window_bounds = array<i64: 2, 1, 128>}, {transform_indices = @transform_1, window_bounds = array<i64: 1, 128>}]} {
    %c0 = arith.constant 0 : index
    %0 = memref.load %arg1[%c0] : memref<6xf32, #tpu.memory_space<smem>>
    %c1 = arith.constant 1 : index
    %1 = memref.load %arg1[%c1] : memref<6xf32, #tpu.memory_space<smem>>
    %c2 = arith.constant 2 : index
    %2 = memref.load %arg1[%c2] : memref<6xf32, #tpu.memory_space<smem>>
    %c3 = arith.constant 3 : index
    %3 = memref.load %arg1[%c3] : memref<6xf32, #tpu.memory_space<smem>>
    %c4 = arith.constant 4 : index
    %4 = memref.load %arg1[%c4] : memref<6xf32, #tpu.memory_space<smem>>
    %c5 = arith.constant 5 : index
    %5 = memref.load %arg1[%c5] : memref<6xf32, #tpu.memory_space<smem>>
    %c0_0 = arith.constant 0 : index
    %c0_1 = arith.constant 0 : index
    %c0_2 = arith.constant 0 : index
    %6 = vector.load %arg2[%c0_0, %c0_1, %c0_2] : memref<2x1x128xf32, #tpu.memory_space<vmem>>, vector<1x1x128xf32>
    %7 = vector.shape_cast %6 : vector<1x1x128xf32> to vector<1x128xf32>
    %8 = vector.broadcast %0 : f32 to vector<1x128xf32>
    %9 = arith.subf %7, %8 : vector<1x128xf32>
    %c1_3 = arith.constant 1 : index
    %c0_4 = arith.constant 0 : index
    %c0_5 = arith.constant 0 : index
    %10 = vector.load %arg2[%c1_3, %c0_4, %c0_5] : memref<2x1x128xf32, #tpu.memory_space<vmem>>, vector<1x1x128xf32>
    %11 = vector.shape_cast %10 : vector<1x1x128xf32> to vector<1x128xf32>
    %12 = vector.broadcast %1 : f32 to vector<1x128xf32>
    %13 = arith.subf %11, %12 : vector<1x128xf32>
    %14 = vector.broadcast %2 : f32 to vector<1x128xf32>
    %15 = arith.mulf %14, %9 : vector<1x128xf32>
    %16 = vector.broadcast %3 : f32 to vector<1x128xf32>
    %17 = arith.mulf %16, %13 : vector<1x128xf32>
    %18 = arith.addf %15, %17 : vector<1x128xf32>
    %19 = arith.mulf %9, %18 : vector<1x128xf32>
    %20 = arith.mulf %13, %13 : vector<1x128xf32>
    %21 = vector.broadcast %4 : f32 to vector<1x128xf32>
    %22 = arith.mulf %21, %20 : vector<1x128xf32>
    %23 = arith.addf %19, %22 : vector<1x128xf32>
    %24 = vector.broadcast %5 : f32 to vector<1x128xf32>
    %25 = arith.addf %23, %24 : vector<1x128xf32>
    %26 = math.exp %25 : vector<1x128xf32>
    %c0_6 = arith.constant 0 : index
    %c0_7 = arith.constant 0 : index
    %27 = vector.load %arg3[%c0_6, %c0_7] : memref<1x128xf32, #tpu.memory_space<vmem>>, vector<1x128xf32>
    tpu.vector_store %arg3[%c0_6, %c0_7], %26 {strides = array<i32>} : memref<1x128xf32, #tpu.memory_space<vmem>>, vector<1x128xf32>,
    return
  }
  func.func @transform_0(%arg0: i32, %arg1: memref<6xf32, #tpu.memory_space<smem>>) -> (i32, i32, i32) {
    %c0_i32 = arith.constant 0 : i32
    %c0_i32_0 = arith.constant 0 : i32
    %c0_i32_1 = arith.constant 0 : i32
    return %c0_i32, %arg0, %c0_i32_0 : i32, i32, i32
  }
  func.func @transform_1(%arg0: i32, %arg1: memref<6xf32, #tpu.memory_space<smem>>) -> (i32, i32) {
    %c0_i32 = arith.constant 0 : i32
    %c0_i32_0 = arith.constant 0 : i32
    return %arg0, %c0_i32 : i32, i32
  }
}

</mosaic_0001>

<bundles_post_ra>
// kernel: tpu_custom_call.1
= control target key start
LH: loop header
LB: loop body
LE: loop exit
PB: predicated region body
PF: predicated region fallthrough
CT: control target
= control target key end

     0   :  { %s149_s0 = inlined_call_operand.hbm [shape: f32[6], index: 0, kind: input, shape index: {}]   ;;  %s150_s1 = inlined_call_operand.vmem [shape: f32[2,1,128], index: 1, kind: input, shape index: {}]   ;;  %s151_s2 = inlined_call_operand.hbm [shape: f32[1,128], index: 2, kind: output, shape index: {}]  }
   0x1   :  { %s66_s11 = scalar_lea.hbm %s149_s0, 16 }
   0x2   :  { %p67_p0 = scmp.ne.s32.totalorder %s149_s0, %s66_s11  ;;  %p70_p1 = scmp.lt.u32.totalorder %s66_s11, %s149_s0 }
   0x4   :  { %p72_p2 = pnand %p70_p1, %p67_p0 }
   0x6   :  { %75 = shalt.err (!%p72_p2)  }
   0x7   :  { %s102_s16 = smov [#allocation3]  }
   0x8   :  { %8 = dma.hbm_to_smem %s149_s0, 16, %s102_s16, [#allocation2] }
   0x9   :  { %98 = dma.done.wait [#allocation2], 16 }
   0xa   :  { %99 = vsyncadd [#allocation2], 4294967280 }
   0xb   :  { %10 = sfence }
   0xc   :  { %s14_s19 = sld [smem:[#allocation3]]  ;;  %s56_s20 = sld [smem:[#allocation3 + $0x1]] }
   0xd   :  { %s57_s21 = sld [smem:[#allocation3 + $0x2]]  ;;  %s58_s22 = sld [smem:[#allocation3 + $0x3]] }
   0xe   :  { %s59_s23 = sld [smem:[#allocation3 + $0x4]] }
   0xf   :  { %11 = vsyncpa [#allocation5], 0  ;;  %v20_v0 = vld [vmem:[%s150_s1] sm:$0x1]  ;;  %v61_v1 = vld [vmem:[%s150_s1 + $0x1] sm:$0x1] }
  0x10   :  { %s60_s28 = sld [smem:[#allocation3 + $0x5]]  ;;  %s103_s0 = smov [#allocation4]  }
  0x11   :  { %s48_s1 = sshll.u32 %s103_s0, 4  ;;  %s49_s1 = int_to_ptr.vmem [resolvable:$true] %s48_s1 }
  0x12   :  { %v21_v2 = vstv %s14_s19  ;;  %v25_v3 = vstv %s56_s20  ;;  %s76_s29 = scalar_lea.vmem %s49_s1, 16  ;;  %s80_s30 = scalar_lea.vmem %s49_s1, 32 }
  0x13   :  { %v22_v4 = vsub.f32 %v20_v0, %v21_v2  ;;  %v26_v5 = vsub.f32 %v61_v1, %v25_v3  ;;  %v27_v6 = vstv %s57_s21  ;;  %v29_v7 = vstv %s58_s22  ;;  %p77_p3 = scmp.ne.s32.totalorder %s49_s1, %s76_s29  ;;  %p81_p4 = scmp.lt.s32.totalorder %s49_s1, %s49_s1 }
  0x14   :  { %v34_v8 = vstv %s59_s23  ;;  %p82_p5 = scmp.lt.s32.totalorder %s80_s30, %s76_s29 }
  0x15   :  { %v28_v9 = vmul.f32 %v27_v6, %v22_v4  ;;  %v30_v10 = vmul.f32 %v29_v7, %v26_v5  ;;  %v33_v11 = vmul.f32 %v26_v5, %v26_v5 }
  0x16   :  { %v37_v15 = vstv %s60_s28  ;;  %p83_p6 = por %p82_p5, %p81_p4 }
  0x17   :  { %v31_v12 = vadd.f32 %v30_v10, %v28_v9  ;;  %v35_v13 = vmul.f32 %v34_v8, %v33_v11 }
  0x18   :  { %p84_p7 = pnand %p83_p6, %p77_p3 }
  0x19   :  { %v32_v14 = vmul.f32 %v31_v12, %v22_v4 }
  0x1b   :  { %v36_v16 = vadd.f32 %v35_v13, %v32_v14 }
  0x1d   :  { %v38_v17 = vadd.f32 %v37_v15, %v36_v16 }
  0x1f   :  { %v39_v18 = vmul.f32 1.442695, %v38_v17 }
  0x21   :  { %64 = vpow2.f32 %v39_v18 }
  0x2b   :  { %v65_v19 = vpop.eup %64 }
  0x2c   :  { %41 = vst [vmem:[#allocation4] sm:$0x1] %v65_v19 }
  0x2d   :  { %87 = shalt.err (!%p84_p7)
}
  0x2e   :  { %s88_s5 = scalar_lea.hbm %s151_s2, 16 }
  0x2f   :  { %p89_p8 = scmp.ne.s32.totalorder %s151_s2, %s88_s5  ;;  %p92_p9 = scmp.lt.u32.totalorder %s88_s5, %s151_s2 }
  0x31   :  { %p94_p10 = pnand %p92_p9, %p89_p8 }
  0x33   :  { %97 = shalt.err (!%p94_p10)
}
  0x34   :  { %51 = dma.vmem_to_hbm [thread:$0]  %s49_s1, 16, %s151_s2, [#allocation5]  }
  0x35   :  { %100 = dma.done.wait [#allocation5], 16  }
  0x36   :  { %101 = vsyncadd [#allocation5], 4294967280 }
  0x37   :  { %55 = vsyncpa [#allocation5], 1 }

</bundles_post_ra>
